<compile_context>
chip_gen: v5e
topology: v5e:2x2
jax: 0.10.0
libtpu: 0.0.40
codegen_flags: <defaults>
</compile_context>

<pallas_src>
import jax
import jax.numpy as jnp
from jax import lax
from jax.experimental import pallas as pl
from jax.experimental.pallas import tpu as pltpu


# (q, k) pairs with q + k == d, for pool-window offset q in {0,1} and conv tap
# k in {0,1,2}.  The same table serves rows and columns of both conv stages.
_DECOMP = (
    ((0, 0),),
    ((0, 1), (1, 0)),
    ((0, 2), (1, 1)),
    ((1, 2),),
)

_HW_IN = 222   # spatial input size implied by fc.in_features == 3*54*54
_PLANE = 56    # input parity planes: 224/4
_P1 = 55       # pool1 (110x110) -> 2x2 parity planes of 55x55
_P2 = 54       # pool2 / fused-kernel output is 54x54
_LANES = 128   # two images per 128-lane row, 64-lane stride


# --------------------------------------------------------------------------
# pltpu.roll direction probe: returns the static shift s such that
#   pltpu.roll(x, s, axis=-1)[..., v] == x[..., (v + 1) % 128]
# Guards the conv kernels against either rotate-direction convention.
_PLUS1_SHIFT = None


def _lane_plus1_shift():
    global _PLUS1_SHIFT
    if _PLUS1_SHIFT is None:
        def probe(x_ref, o_ref):
            o_ref[...] = pltpu.roll(x_ref[...], 127, 1)

        x = lax.broadcasted_iota(jnp.float32, (8, _LANES), 1)
        y = jax.device_get(pl.pallas_call(
            probe, out_shape=jax.ShapeDtypeStruct((8, _LANES), jnp.float32))(x))
        y00 = float(y[0, 0])
        if y00 == 1.0:          # jnp.roll convention: out[v] = in[v - shift]
            _PLUS1_SHIFT = 127
        elif y00 == 127.0:      # opposite convention: out[v] = in[v + shift]
            _PLUS1_SHIFT = 1
        else:
            raise RuntimeError(f"unexpected pltpu.roll behaviour: {y[0, :4]}")
    return _PLUS1_SHIFT


# --------------------------------------------------------------------------
# Fused conv1+ReLU+pool1 -> conv2+ReLU+pool2 kernel (one image PAIR per step).
def _make_fused_kernel(plus1_shift):
    def kernel(w1_ref, b1_ref, w2_ref, b2_ref, x_ref, o_ref, pool1_ref):
        """x_ref:     (48, 56, 128) VMEM; plane ci*16 + mr*4 + mc, row i,
                      lane 64*p + j  holds  x[pair_img p, ci, 4i+mr, 4j+mc]
           o_ref:     (3, 54, 128)  VMEM; lane 64*p + v holds pool2[p, co, w, v]
           pool1_ref: (36, 55, 128) VMEM scratch; plane co*4 + a*2 + g, row u,
                      lane 64*p + v holds pool1[p, co, 2u+a, 2v+g]
           w*/b* refs: SMEM flattened conv weights / biases."""

        def shifted(op, ac):
            # +1-column lane shift (both 64-lane image halves shift together);
            # XLU op, hidden under the VALU-bound FMAs.
            return pltpu.roll(op, plus1_shift, 1) if ac else op

        # -------------- stage 1: conv1 + ReLU + 2x2 max-pool ----------------
        def stage1(co, carry):
            wbase = co * 27
            bias = b1_ref[co]
            for a in range(2):            # pool1 row parity
                for g in range(2):        # pool1 col parity
                    acc = [[jnp.zeros((_P1, _LANES), jnp.float32)
                            for _ in range(2)] for _ in range(2)]
                    for ci in range(3):
                        # Hoist the 9 scalar weight loads for this (co, ci):
                        # SMEM->sreg once, reused by every tap below.
                        w = [w1_ref[wbase + ci * 9 + t] for t in range(9)]
                        for dr in range(4):                 # dr = qr + kh
                            orow = 2 * a + dr
                            mr, ar = orow % 4, orow // 4
                            for dc in range(4):             # dc = qc + kw
                                ocol = 2 * g + dc
                                mc, ac = ocol % 4, ocol // 4
                                # Padding invariant (rows/cols 222,223 added by
                                # the parity split are never read into valid
                                # lanes): checked statically at trace time.
                                assert not (mr >= 2 and ar == 1)
                                assert not (mc >= 2 and ac == 1)
                                op = shifted(
                                    x_ref[ci * 16 + mr * 4 + mc,
                                          ar:ar + _P1, :], ac)
                                for (qr, kh) in _DECOMP[dr]:
                                    for (qc, kw) in _DECOMP[dc]:
                                        acc[qr][qc] = (
                                            acc[qr][qc] + w[kh * 3 + kw] * op)
                    pooled = jnp.maximum(jnp.maximum(acc[0][0], acc[0][1]),
                                         jnp.maximum(acc[1][0], acc[1][1]))
                    # relu(max(conv) + b) == max over window of relu(conv + b)
                    pool1_ref[co * 4 + a * 2 + g] = jnp.maximum(
                        pooled + bias, 0.0)
            return carry

        # -------------- stage 2: conv2 + ReLU + 2x2 max-pool ----------------
        def stage2(co, carry):
            wbase = co * 81
            bias = b2_ref[co]
            acc = [[jnp.zeros((_P2, _LANES), jnp.float32)
                    for _ in range(2)] for _ in range(2)]
            for ci in range(9):
                w = [w2_ref[wbase + ci * 9 + t] for t in range(9)]
                for dr in range(4):                         # dr = beta + kh
                    mr, ar = dr % 2, dr // 2
                    for dc in range(4):                     # dc = delta + kw
                        mc, ac = dc % 2, dc // 2
                        op = shifted(
                            pool1_ref[ci * 4 + mr * 2 + mc, ar:ar + _P2, :], ac)
                        for (qr, kh) in _DECOMP[dr]:
                            for (qc, kw) in _DECOMP[dc]:
                                acc[qr][qc] = acc[qr][qc] + w[kh * 3 + kw] * op
            pooled = jnp.maximum(jnp.maximum(acc[0][0], acc[0][1]),
                                 jnp.maximum(acc[1][0], acc[1][1]))
            o_ref[co] = jnp.maximum(pooled + bias, 0.0)
            return carry

        # Moderate unrolling so the scheduler can overlap slab loads / rolls
        # across output-channel iterations without blowing up the body size.
        lax.fori_loop(0, 9, stage1, 0, unroll=3)
        lax.fori_loop(0, 3, stage2, 0, unroll=True)

    return kernel


def _pack_input_pairs(x):
    """(N,3,222,222) -> (ceil(N/2), 48, 56, 128).

    plane ci*16 + mr*4 + mc, row i, lane 64*p + j == x[2*b+p, ci, 4i+mr, 4j+mc].
    One cheap XLA pad+transpose pass over the input; the zero padding it adds
    (spatial rows/cols 222,223 and lanes 56..63 of each image half) is never
    folded into valid outputs (enforced statically in the kernel).
    """
    n, c, h, w = x.shape
    if n % 2:
        x = jnp.pad(x, ((0, 1), (0, 0), (0, 0), (0, 0)))
        n += 1
    ph, pw = (-h) % 4, (-w) % 4
    xp = jnp.pad(x, ((0, 0), (0, 0), (0, ph), (0, pw)))
    hq, wq = (h + ph) // 4, (w + pw) // 4
    assert hq == _PLANE and wq == _PLANE
    n2 = n // 2
    xr = xp.reshape(n2, 2, c, hq, 4, wq, 4)
    # (n2, p, ci, i, mr, j, mc) -> (n2, ci, mr, mc, i, p, j)
    xt = xr.transpose(0, 2, 4, 6, 3, 1, 5)
    xt = jnp.pad(xt, ((0, 0),) * 6 + ((0, 64 - wq),))
    return xt.reshape(n2, c * 16, hq, _LANES)


def fused_conv_stack(x, w1, b1, w2, b2):
    n = x.shape[0]
    assert x.shape[1:] == (3, _HW_IN, _HW_IN), x.shape
    x_pp = _pack_input_pairs(x)              # (n2, 48, 56, 128)
    n2 = x_pp.shape[0]
    kernel = _make_fused_kernel(_lane_plus1_shift())
    out = pl.pallas_call(
        kernel,
        out_shape=jax.ShapeDtypeStruct((n2, 3, _P2, _LANES), jnp.float32),
        grid=(n2,),
        in_specs=[
            pl.BlockSpec(memory_space=pltpu.MemorySpace.SMEM),   # w1 flat (243,)
            pl.BlockSpec(memory_space=pltpu.MemorySpace.SMEM),   # b1 (9,)
            pl.BlockSpec(memory_space=pltpu.MemorySpace.SMEM),   # w2 flat (243,)
            pl.BlockSpec(memory_space=pltpu.MemorySpace.SMEM),   # b2 (3,)
            pl.BlockSpec((None, 48, _PLANE, _LANES), lambda i: (i, 0, 0, 0)),
        ],
        out_specs=pl.BlockSpec((None, 3, _P2, _LANES), lambda i: (i, 0, 0, 0)),
        scratch_shapes=[pltpu.VMEM((36, _P1, _LANES), jnp.float32)],
        compiler_params=pltpu.CompilerParams(
            dimension_semantics=("parallel",)),   # v7x: pairs split across TCs
    )(w1.reshape(-1), b1, w2.reshape(-1), b2, x_pp)
    # Unpack the two images per lane row: (n2,3,54,128) -> (2*n2,3,54,54).
    out = out.reshape(n2, 3, _P2, 2, 64)[..., :_P2]
    out = out.transpose(0, 3, 1, 2, 4).reshape(2 * n2, 3, _P2, _P2)
    return out[:n]


# ----------------------------- fc + sigmoid ----------------------------------
def _fc_sigmoid_kernel(x_ref, w_ref, b_ref, o_ref):
    # w is kept lane-dense as (num_classes, 8748); contract the last dims.
    z = lax.dot_general(x_ref[...], w_ref[...],
                        dimension_numbers=(((1,), (1,)), ((), ())),
                        preferred_element_type=jnp.float32)
    z = z + b_ref[...]
    o_ref[...] = 1.0 / (1.0 + jnp.exp(-z))


def fc_sigmoid(x, w, b):
    n = x.shape[0]
    nc = w.shape[0]
    return pl.pallas_call(
        _fc_sigmoid_kernel,
        out_shape=jax.ShapeDtypeStruct((n, nc), jnp.float32),
        in_specs=[pl.BlockSpec(memory_space=pltpu.MemorySpace.VMEM)] * 3,
        out_specs=pl.BlockSpec(memory_space=pltpu.MemorySpace.VMEM),
    )(x, w, b.reshape(1, nc))


# --------------------------------- forward -----------------------------------
@jax.jit
def cnn_net_forward(params, x):
    # nn.Dropout2d(0.25) is the identity in eval/inference mode.
    h = fused_conv_stack(x, params["w1"], params["b1"],
                         params["w2"], params["b2"])
    n = h.shape[0]
    h = h.reshape(n, -1)   # contiguous (C,H,W) flatten, same order as PyTorch
    return fc_sigmoid(h, params["w_fc"], params["b_fc"])


def init_params(key, num_classes):
    # Deterministic, PyTorch-style uniform(-1/sqrt(fan_in), 1/sqrt(fan_in)) init.
    k1, k2, k3, k4, k5, k6 = jax.random.split(key, 6)

    def u(k, shape, fan_in):
        bound = 1.0 / float(fan_in) ** 0.5
        return jax.random.uniform(k, shape, jnp.float32, -bound, bound)

    w1 = u(k1, (9, 3, 3, 3), 3 * 3 * 3)
    b1 = u(k2, (9,), 3 * 3 * 3)
    w2 = u(k3, (3, 9, 3, 3), 9 * 3 * 3)
    b2 = u(k4, (3,), 9 * 3 * 3)
    w_fc = u(k5, (num_classes, 8748), 8748)   # PyTorch Linear layout (out, in)
    b_fc = u(k6, (num_classes,), 8748)
    return {"w1": w1, "b1": b1, "w2": w2, "b2": b2,
            "w_fc": w_fc, "b_fc": b_fc}


# --------------------------- pure-JAX reference -------------------------------
@jax.jit
def _reference_forward(params, x):
    dn = ("NCHW", "OIHW", "NCHW")
    hp = lax.Precision.HIGHEST
    h = lax.conv_general_dilated(x, params["w1"], (1, 1), "VALID",
                                 dimension_numbers=dn, precision=hp)
    h = jnp.maximum(h + params["b1"][None, :, None, None], 0.0)
    h = lax.reduce_window(h, -jnp.inf, lax.max,
                          (1, 1, 2, 2), (1, 1, 2, 2), "VALID")
    h = lax.conv_general_dilated(h, params["w2"], (1, 1), "VALID",
                                 dimension_numbers=dn, precision=hp)
    h = jnp.maximum(h + params["b2"][None, :, None, None], 0.0)
    h = lax.reduce_window(h, -jnp.inf, lax.max,
                          (1, 1, 2, 2), (1, 1, 2, 2), "VALID")
    h = h.reshape(x.shape[0], -1)
    z = jnp.dot(h, params["w_fc"].T, precision=hp) + params["b_fc"]
    return 1.0 / (1.0 + jnp.exp(-z))


if __name__ == "__main__":
    num_classes = 10
    key = jax.random.PRNGKey(0)
    pkey, xkey = jax.random.split(key)
    params = init_params(pkey, num_classes)

    # fc expects 8748 = 3*54*54 flattened features -> spatial input must be 222.
    # Batch 4 -> 2 image-pair grid steps, so both v7x TensorCores get work.
    x = jax.random.normal(xkey, (4, 3, 222, 222), jnp.float32)

    _lane_plus1_shift()   # warm the roll-direction probe outside any jit trace

    out = jax.block_until_ready(cnn_net_forward(params, x))
    assert out.shape == (4, num_classes), out.shape
    assert bool(jnp.all(jnp.isfinite(out)))
    assert bool(jnp.all((out > 0.0) & (out < 1.0)))  # sigmoid range

    # Numerical check against a pure-JAX reference (fc matmul in the kernel
    # uses the MXU's default f32 precision, so allow ~1e-2 slack).
    ref = jax.block_until_ready(_reference_forward(params, x))
    max_err = float(jnp.max(jnp.abs(out - ref)))
    assert max_err < 1e-2, f"max abs err vs reference: {max_err}"

    print("KERNEL_OK")
</pallas_src>

<mosaic_0001>
module attributes {stable_mosaic.version = 11 : i64} {
  func.func @probe(%arg0: memref<8x128xf32, #tpu.memory_space<vmem>>, %arg1: memref<8x128xf32, #tpu.memory_space<vmem>>) attributes {dimension_semantics = [], scalar_prefetch = 0 : i64, scratch_operands = 0 : i64, tpu.core_type = #tpu.core_type<tc>} {
    %c0 = arith.constant 0 : index
    %c0_0 = arith.constant 0 : index
    %0 = vector.load %arg0[%c0, %c0_0] : memref<8x128xf32, #tpu.memory_space<vmem>>, vector<8x128xf32>
    %c127_i32 = arith.constant 127 : i32
    %1 = tpu.dynamic_rotate %0 by %c127_i32 dim 1 : vector<8x128xf32>, i32 -> vector<8x128xf32>
    %c0_1 = arith.constant 0 : index
    %c0_2 = arith.constant 0 : index
    %2 = vector.load %arg1[%c0_1, %c0_2] : memref<8x128xf32, #tpu.memory_space<vmem>>, vector<8x128xf32>
    tpu.vector_store %arg1[%c0_1, %c0_2], %1 {strides = array<i32>} : memref<8x128xf32, #tpu.memory_space<vmem>>, vector<8x128xf32>,
    return
  }
}

</mosaic_0001>

<bundles_post_ra>
// kernel: tpu_custom_call.1
= control target key start
LH: loop header
LB: loop body
LE: loop exit
PB: predicated region body
PF: predicated region fallthrough
CT: control target
= control target key end

     0   :  { %6 = vsyncpa [#allocation3], 0  ;;  %s118_s0 = inlined_call_operand.hbm [shape: f32[8,128], index: 0, kind: input, shape index: {}]   ;;  %s119_s1 = inlined_call_operand.hbm [shape: f32[8,128], index: 1, kind: output, shape index: {}]  }
   0x1   :  { %7 = vsyncpa [#allocation4], 0  ;;  %s13_s8 = sshll.u32 %s118_s0, 4  ;;  %s99_s9 = smov [#allocation2]   ;;  %s14_s8 = int_to_ptr.hbm [resolvable:$true] %s13_s8 }
   0x2   :  { %s15_s10 = sshll.u32 %s99_s9, 4  ;;  %s16_s10 = int_to_ptr.vmem [resolvable:$true] %s15_s10 }
   0x3   :  { %18 = dma.hbm_to_vmem [thread:$0]  %s14_s8, 128, %s16_s10, [#allocation3]  }
   0x4   :  { %95 = dma.done.wait [#allocation3], 128  }
   0x5   :  { %96 = vsyncadd [#allocation3], 4294967168  ;;  %v23_v0 = vld [vmem:[#allocation2] sm:$0xff]  ;;  %s100_s11 = smov 127   ;;  %s101_s12 = smov [#allocation5]  }
   0x6   :  { %24 = vrot.lane.b32.xlu0 %v23_v0, %s100_s11  ;;  %s32_s13 = sshll.u32 %s101_s12, 4  ;;  %s34_s16 = sshll.u32 %s119_s1, 4  ;;  %s33_s13 = int_to_ptr.vmem [resolvable:$true] %s32_s13  ;;  %s35_s16 = int_to_ptr.hbm [resolvable:$true] %s34_s16 }
  0x78   :  { %v25_v1 = vpop.permute.xlu0 %24 }
  0x79   :  { %26 = vst [vmem:[#allocation5] sm:$0xff] %v25_v1 }
  0x7a   :  { %37 = dma.vmem_to_hbm [thread:$0]  %s33_s13, 128, %s35_s16, [#allocation4]  }
  0x7b   :  { %97 = dma.done.wait [#allocation4], 128  }
  0x7c   :  { %98 = vsyncadd [#allocation4], 4294967168 }
  0x7d   :  { %42 = vsyncpa [#allocation3], 1 }
  0x7e   :  { %43 = vsyncpa [#allocation4], 1 }

</bundles_post_ra>
